<compile_context>
chip_gen: v7x
topology: tpu7x:2x2x1
jax: 0.10.0
libtpu: 0.0.40
codegen_flags: <defaults>
</compile_context>

<pallas_src>
import functools
import math
import warnings

import jax
import jax.numpy as jnp
from jax.experimental import pallas as pl
from jax.experimental.pallas import tpu as pltpu

_INV_SQRT2 = 1.0 / math.sqrt(2.0)
_MiB = 1024 * 1024


def _round_up(v, m):
    return (v + m - 1) // m * m


def _gelu_exact_f32(h):
    # Exact (erf) GELU, matching torch.nn.GELU() default.  Kept in f32 on all chips
    # (v5e has no bf16 VPU/EUP; also preserves parity with the PyTorch module).
    # TODO(synk): optional bf16/tanh GELU variant for v6e/v7x VALU relief.
    return 0.5 * h * (1.0 + jax.lax.erf(h * _INV_SQRT2))


# --------------------------------------------------------------------------- kernels
def _mlp_resident_kernel(x_ref, w1_ref, b1_ref, w2_ref, b2_ref, o_ref):
    # x_ref: (TM, Dp) in the input dtype; cast to the MXU dtype here (not in the wrapper).
    # w1_ref: (Dp, Hp)  b1_ref: (1, Hp) f32   w2_ref: (Hp, Op)  b2_ref: (1, Op) f32
    x = x_ref[...].astype(w1_ref.dtype)
    h = jnp.dot(x, w1_ref[...], preferred_element_type=jnp.float32) + b1_ref[...]
    h = _gelu_exact_f32(h)
    y = jnp.dot(h.astype(w2_ref.dtype), w2_ref[...],
                preferred_element_type=jnp.float32) + b2_ref[...]
    o_ref[...] = y.astype(o_ref.dtype)


def _mlp_htiled_kernel(x_ref, w1_ref, b1_ref, w2_ref, b2_ref, o_ref, acc_ref):
    # Hidden (reduction) axis is the LAST grid axis ("arbitrary"); f32 accumulator scratch.
    hi = pl.program_id(1)

    @pl.when(hi == 0)
    def _init():
        acc_ref[...] = jnp.zeros_like(acc_ref)

    x = x_ref[...].astype(w1_ref.dtype)
    h = jnp.dot(x, w1_ref[...], preferred_element_type=jnp.float32) + b1_ref[...]
    h = _gelu_exact_f32(h)
    acc_ref[...] += jnp.dot(h.astype(w2_ref.dtype), w2_ref[...],
                            preferred_element_type=jnp.float32)

    @pl.when(hi == pl.num_programs(1) - 1)
    def _finish():
        o_ref[...] = (acc_ref[...] + b2_ref[...]).astype(o_ref.dtype)


# ------------------------------------------------------------------- hardware probes
@functools.lru_cache(maxsize=1)
def _device_kind():
    try:
        return jax.devices()[0].device_kind.lower()
    except Exception:  # pragma: no cover
        return ""


@functools.lru_cache(maxsize=1)
def _vmem_capacity_bytes():
    try:
        cap = int(pltpu.get_tpu_info().vmem_capacity_bytes)
        if cap > 0:
            return cap
    except Exception:  # info API not available everywhere; fall back to device_kind
        pass
    return 64 * _MiB if "v7" in _device_kind() else 128 * _MiB


@functools.lru_cache(maxsize=1)
def _num_tensorcores():
    # v7x packs 2 TensorCores per chip; v5e/v6e have 1.
    return 2 if "v7" in _device_kind() else 1


@functools.lru_cache(maxsize=1)
def _pipeline_mode_supported():
    # Feature check (construction-time only) for single-buffered resident operands.
    if not hasattr(pl, "Buffered"):
        return False
    try:
        pl.BlockSpec((8, 128), lambda i: (0, 0), pipeline_mode=pl.Buffered(1))
    except (TypeError, ValueError):
        return False
    return True


_BUFFERED_OK = {"value": None}  # resolved at first lowering; cached for later calls


def _resident_spec(shape, index_map, use_buffered):
    # Operands with a constant index_map are resident; single-buffer them to halve VMEM.
    if use_buffered:
        return pl.BlockSpec(shape, index_map, pipeline_mode=pl.Buffered(1))
    return pl.BlockSpec(shape, index_map)


# ----------------------------------------------------------------- VMEM footprint model
def _resident_bytes(tm, Dp, Hp, Op, wbytes, xb, ob, weight_bufs):
    return (weight_bufs * (Dp * Hp + Hp * Op) * wbytes   # resident weights
            + 2 * tm * Dp * xb                            # double-buffered x tiles
            + 2 * tm * Op * ob                            # double-buffered out tiles
            + tm * Dp * wbytes                            # in-kernel x cast copy
            + tm * Hp * 4                                 # f32 hidden
            + tm * Hp * wbytes                            # hidden cast copy for fc2
            + 2 * (Hp + Op) * 4                           # f32 biases
            + 2 * _MiB)                                   # Mosaic internal scratch headroom


def _htiled_bytes(tm, Dp, th, Op, wbytes, xb, ob):
    return (2 * (Dp * th + th * Op) * wbytes              # double-buffered weight slabs
            + 2 * tm * Dp * xb + 2 * tm * Op * ob         # x / out tiles
            + tm * Dp * wbytes                            # in-kernel x cast copy
            + tm * th * 4 + tm * th * wbytes              # f32 hidden + cast copy
            + tm * Op * 4                                 # f32 accumulator scratch
            + 2 * (th + Op) * 4                           # bias slabs
            + 2 * _MiB)


def _fit_tm(tm_target, bytes_fn, budget, sub):
    t = max(sub, _round_up(tm_target, sub))
    while t > sub and bytes_fn(t) > budget:
        t = max(sub, _round_up(t // 2, sub))
    return t


# ----------------------------------------------------------------------------- wrapper
def make_mlp(w1, b1, w2, b2, *,
             compute_dtype=jnp.bfloat16,
             tm=256, th=256,
             force_hidden_tiled=False):
    """Pad & cast the weights ONCE and return a forward(x) closure.

    w1: (Din, H); b1: (H,); w2: (H, Dout); b2: (Dout,).  forward(x) takes x of shape
    (..., Din) and returns (..., Dout) in x.dtype.
    """
    w1 = jnp.asarray(w1)
    b1 = jnp.asarray(b1)
    w2 = jnp.asarray(w2)
    b2 = jnp.asarray(b2)
    Din, H = w1.shape
    Dout = w2.shape[1]
    assert w2.shape[0] == H and b1.shape == (H,) and b2.shape == (Dout,)

    compute_dtype = jnp.dtype(compute_dtype)
    wbytes = compute_dtype.itemsize
    sub = {4: 8, 2: 16, 1: 32}.get(wbytes, 8)   # sublane multiple for the compute dtype

    # Feature dims padded to lane width (128): lane-dense loads/stores, dense MXU operands.
    Dp = _round_up(Din, 128)
    Op = _round_up(Dout, 128)
    th = max(128, _round_up(th, 128))
    Hp_res = _round_up(H, 128)

    # Generation-aware VMEM budget: ~48 MiB on v7x (64 MiB/TC), ~96 MiB on v5e/v6e.
    cap = _vmem_capacity_bytes()
    budget = (cap * 3) // 4
    vmem_limit = int(min(cap - 4 * _MiB, budget + 8 * _MiB))

    weight_bufs = 1 if _pipeline_mode_supported() else 2
    tm_nom = max(sub, _round_up(tm, sub))

    use_h_tiled = force_hidden_tiled or (
        _resident_bytes(tm_nom, Dp, Hp_res, Op, wbytes, 4, 4, weight_bufs) > budget)
    Hp = _round_up(H, th) if use_h_tiled else Hp_res

    # ---- weight padding / cast hoisted out of the per-call hot path (done once) ------
    # Zero padding keeps the math exact: padded input cols hit zero weight rows, padded
    # hidden cols give GELU(0)=0 against zero w2 rows.
    w1p = jnp.pad(w1.astype(compute_dtype), ((0, Dp - Din), (0, Hp - H)))
    w2p = jnp.pad(w2.astype(compute_dtype), ((0, Hp - H), (0, Op - Dout)))
    b1p = jnp.pad(b1.astype(jnp.float32), (0, Hp - H)).reshape(1, Hp)
    b2p = jnp.pad(b2.astype(jnp.float32), (0, Op - Dout)).reshape(1, Op)

    def forward(x):
        assert x.shape[-1] == Din, f"expected last dim {Din}, got {x.shape}"
        lead = x.shape[:-1]
        M = 1
        for d in lead:
            M *= int(d)
        out_dtype = x.dtype
        xb = x.dtype.itemsize
        ob = out_dtype.itemsize

        # ---- row-tile selection ----------------------------------------------------
        if use_h_tiled:
            # Streaming path: total weight HBM traffic is (M/tm) * |W|; push tm up.
            tm_eff = _fit_tm(max(tm_nom, 512),
                             lambda t: _htiled_bytes(t, Dp, th, Op, wbytes, xb, ob),
                             budget, sub)
        else:
            tm_eff = _fit_tm(tm_nom,
                             lambda t: _resident_bytes(t, Dp, Hp, Op, wbytes, xb, ob,
                                                       weight_bufs),
                             budget, sub)
        tm_eff = min(tm_eff, _round_up(M, sub))
        # v7x megacore: keep >= 2 M-tiles so both TensorCores get work.
        if _num_tensorcores() >= 2 and M > 2 * sub:
            tm_eff = min(tm_eff, _round_up(pl.cdiv(M, 2), sub))
        tm_eff = max(tm_eff, sub)
        Mp = _round_up(M, tm_eff)

        # ---- pad x only (kept in its HBM dtype; cast happens inside the kernel) -----
        x2d = x.reshape(M, Din)
        if Mp != M or Dp != Din:
            x2d = jnp.pad(x2d, ((0, Mp - M), (0, Dp - Din)))

        def build(use_buffered):
            if not use_h_tiled:
                grid = (Mp // tm_eff,)
                in_specs = [
                    pl.BlockSpec((tm_eff, Dp), lambda i: (i, 0)),                    # x
                    _resident_spec((Dp, Hp), lambda i: (0, 0), use_buffered),        # w1
                    _resident_spec((1, Hp), lambda i: (0, 0), use_buffered),         # b1
                    _resident_spec((Hp, Op), lambda i: (0, 0), use_buffered),        # w2
                    _resident_spec((1, Op), lambda i: (0, 0), use_buffered),         # b2
                ]
                out_specs = pl.BlockSpec((tm_eff, Op), lambda i: (i, 0))
                scratch = ()
                kern = _mlp_resident_kernel
                dims = ("parallel",)
            else:
                grid = (Mp // tm_eff, Hp // th)   # reduction (H) axis last, "arbitrary"
                in_specs = [
                    pl.BlockSpec((tm_eff, Dp), lambda i, h: (i, 0)),   # x (resident in h)
                    pl.BlockSpec((Dp, th), lambda i, h: (0, h)),       # w1 slab
                    pl.BlockSpec((1, th), lambda i, h: (0, h)),        # b1 slab
                    pl.BlockSpec((th, Op), lambda i, h: (h, 0)),       # w2 slab
                    _resident_spec((1, Op), lambda i, h: (0, 0), use_buffered),
                ]
                out_specs = pl.BlockSpec((tm_eff, Op), lambda i, h: (i, 0))
                scratch = (pltpu.VMEM((tm_eff, Op), jnp.float32),)
                kern = _mlp_htiled_kernel
                dims = ("parallel", "arbitrary")

            return pl.pallas_call(
                kern,
                out_shape=jax.ShapeDtypeStruct((Mp, Op), out_dtype),
                grid_spec=pltpu.PrefetchScalarGridSpec(
                    num_scalar_prefetch=0,
                    grid=grid,
                    in_specs=in_specs,
                    out_specs=out_specs,
                    scratch_shapes=scratch),
                compiler_params=pltpu.CompilerParams(
                    dimension_semantics=dims,
                    vmem_limit_bytes=vmem_limit),
            )(x2d, w1p, b1p, w2p, b2p)

        if _BUFFERED_OK["value"] is None:
            _BUFFERED_OK["value"] = _pipeline_mode_supported()
        if _BUFFERED_OK["value"]:
            try:
                out = build(True)
            except (pltpu.LoweringException, NotImplementedError, TypeError) as e:
                # Narrow fallback: only Buffered(1)-specific failures; real compile /
                # VMEM errors re-raise from the retry below and surface to the caller.
                warnings.warn(
                    f"pl.Buffered(1) resident weights unsupported; using default "
                    f"double buffering ({type(e).__name__}: {e})")
                _BUFFERED_OK["value"] = False
                out = build(False)
        else:
            out = build(False)

        out = out[:M, :Dout]
        return out.reshape(*lead, Dout)

    return forward


def mlp_forward(x, w1, b1, w2, b2, **kwargs):
    """One-shot convenience wrapper (for repeated calls, prefer make_mlp + reuse)."""
    return make_mlp(w1, b1, w2, b2, **kwargs)(x)


# ---------------------------------------------------------------------------- testing
def _reference_mlp(x, w1, b1, w2, b2):
    hp = jax.lax.Precision.HIGHEST
    h = jnp.einsum("bnd,dh->bnh", x, w1, precision=hp) + b1
    h = 0.5 * h * (1.0 + jax.lax.erf(h * _INV_SQRT2))
    return jnp.einsum("bnh,ho->bno", h, w2, precision=hp) + b2


if __name__ == "__main__":
    key = jax.random.PRNGKey(0)
    kx, k1, k2, k3, k4, kx2, k5, k6, k7, k8 = jax.random.split(key, 10)

    # ---- config 1: module defaults (in=32, hidden=64, out=32), tiny token count ------
    B, N, Din, Hdim, Dout = 2, 8, 32, 64, 32
    x = jax.random.normal(kx, (B, N, Din), dtype=jnp.float32)
    lim1 = 1.0 / math.sqrt(Din)
    lim2 = 1.0 / math.sqrt(Hdim)
    w1 = jax.random.uniform(k1, (Din, Hdim), jnp.float32, -lim1, lim1)
    b1 = jax.random.uniform(k2, (Hdim,), jnp.float32, -lim1, lim1)
    w2 = jax.random.uniform(k3, (Hdim, Dout), jnp.float32, -lim2, lim2)
    b2 = jax.random.uniform(k4, (Dout,), jnp.float32, -lim2, lim2)

    ref = _reference_mlp(x, w1, b1, w2, b2)

    # f32-MXU weight-resident path (tight tolerance); reuse the prepared closure twice.
    fwd_f32 = make_mlp(w1, b1, w2, b2, compute_dtype=jnp.float32)
    out = jax.block_until_ready(fwd_f32(x))
    assert out.shape == (B, N, Dout) and out.dtype == x.dtype
    assert jnp.allclose(out, ref, atol=1e-5, rtol=1e-5), "resident-path mismatch"
    out_again = jax.block_until_ready(fwd_f32(x))
    assert jnp.allclose(out_again, out), "prepared-closure reuse mismatch"

    # f32 hidden-tiled (weight-streaming) path, forced.
    out_t = jax.block_until_ready(
        mlp_forward(x, w1, b1, w2, b2, compute_dtype=jnp.float32,
                    force_hidden_tiled=True, th=128))
    assert jnp.allclose(out_t, ref, atol=1e-5, rtol=1e-5), "hidden-tiled mismatch"

    # Default path: bf16 MXU, f32 accumulation + f32 GELU — looser tolerance.
    out_bf16 = jax.block_until_ready(mlp_forward(x, w1, b1, w2, b2))
    assert out_bf16.dtype == x.dtype
    assert jnp.allclose(out_bf16, ref, atol=5e-2, rtol=5e-2), "bf16-path mismatch"

    # ---- config 2: lane-aligned dims; real multi-step H reduction + multiple M tiles --
    B2, N2, Din2, H2, Dout2 = 2, 64, 128, 256, 128
    x2 = jax.random.normal(kx2, (B2, N2, Din2), dtype=jnp.float32)
    l1 = 1.0 / math.sqrt(Din2)
    l2 = 1.0 / math.sqrt(H2)
    w1b = jax.random.uniform(k5, (Din2, H2), jnp.float32, -l1, l1)
    b1b = jax.random.uniform(k6, (H2,), jnp.float32, -l1, l1)
    w2b = jax.random.uniform(k7, (H2, Dout2), jnp.float32, -l2, l2)
    b2b = jax.random.uniform(k8, (Dout2,), jnp.float32, -l2, l2)

    ref2 = _reference_mlp(x2, w1b, b1b, w2b, b2b)

    # Forced hidden-tiled, f32, 2-step H reduction.
    out2 = jax.block_until_ready(
        mlp_forward(x2, w1b, b1b, w2b, b2b, compute_dtype=jnp.float32,
                    force_hidden_tiled=True, th=128))
    assert out2.shape == (B2, N2, Dout2)
    assert jnp.allclose(out2, ref2, atol=1e-4, rtol=1e-4), "h-tiled large mismatch"

    # Resident path with multiple M tiles (tm=64 over M=128), f32.
    out2r = jax.block_until_ready(
        mlp_forward(x2, w1b, b1b, w2b, b2b, compute_dtype=jnp.float32, tm=64))
    assert jnp.allclose(out2r, ref2, atol=1e-4, rtol=1e-4), "multi-M-tile mismatch"

    # Default bf16 path on config 2 (auto selection).
    out2b = jax.block_until_ready(mlp_forward(x2, w1b, b1b, w2b, b2b))
    assert jnp.allclose(out2b, ref2, atol=5e-2, rtol=5e-2), "bf16 config-2 mismatch"

    print("KERNEL_OK")
</pallas_src>

<mosaic_0001>
module attributes {stable_mosaic.version = 11 : i64} {
  func.func @_mlp_resident_kernel(%arg0: i32, %arg1: memref<16x128xf32, #tpu.memory_space<vmem>>, %arg2: memref<128x128xf32, #tpu.memory_space<vmem>>, %arg3: memref<1x128xf32, #tpu.memory_space<vmem>>, %arg4: memref<128x128xf32, #tpu.memory_space<vmem>>, %arg5: memref<1x128xf32, #tpu.memory_space<vmem>>, %arg6: memref<16x128xf32, #tpu.memory_space<vmem>>) attributes {dimension_semantics = [#tpu.dimension_semantics<parallel>], iteration_bounds = array<i64: 1>, scalar_prefetch = 0 : i64, scratch_operands = 0 : i64, tpu.core_type = #tpu.core_type<tc>, window_params = [{transform_indices = @transform_0, window_bounds = array<i64: 16, 128>}, {pipeline_mode = #tpu.pipeline_mode<synchronous>, transform_indices = @transform_1, window_bounds = array<i64: 128, 128>}, {pipeline_mode = #tpu.pipeline_mode<synchronous>, transform_indices = @transform_2, window_bounds = array<i64: 1, 128>}, {pipeline_mode = #tpu.pipeline_mode<synchronous>, transform_indices = @transform_3, window_bounds = array<i64: 128, 128>}, {pipeline_mode = #tpu.pipeline_mode<synchronous>, transform_indices = @transform_4, window_bounds = array<i64: 1, 128>}, {transform_indices = @transform_5, window_bounds = array<i64: 16, 128>}]} {
    %c0 = arith.constant 0 : index
    %c0_0 = arith.constant 0 : index
    %0 = vector.load %arg1[%c0, %c0_0] : memref<16x128xf32, #tpu.memory_space<vmem>>, vector<16x128xf32>
    %c0_1 = arith.constant 0 : index
    %c0_2 = arith.constant 0 : index
    %1 = vector.load %arg2[%c0_1, %c0_2] : memref<128x128xf32, #tpu.memory_space<vmem>>, vector<128x128xf32>
    %cst = arith.constant dense<0.000000e+00> : vector<16x128xf32>
    %2 = tpu.matmul %0, %1, %cst {dimension_numbers = #tpu.dot_dimension_numbers<[1], [0], [0], [1], [0, 0, 1, 1], [], []>} : vector<16x128xf32>, vector<128x128xf32>, vector<16x128xf32> -> vector<16x128xf32>
    %c0_3 = arith.constant 0 : index
    %c0_4 = arith.constant 0 : index
    %3 = vector.load %arg3[%c0_3, %c0_4] : memref<1x128xf32, #tpu.memory_space<vmem>>, vector<1x128xf32>
    %4 = vector.broadcast %3 : vector<1x128xf32> to vector<16x128xf32>
    %5 = arith.addf %2, %4 : vector<16x128xf32>
    %cst_5 = arith.constant 5.000000e-01 : f32
    %6 = vector.broadcast %cst_5 : f32 to vector<16x128xf32>
    %7 = arith.mulf %6, %5 : vector<16x128xf32>
    %cst_6 = arith.constant 0.707106769 : f32
    %8 = vector.broadcast %cst_6 : f32 to vector<16x128xf32>
    %9 = arith.mulf %5, %8 : vector<16x128xf32>
    %10 = math.erf %9 : vector<16x128xf32>
    %cst_7 = arith.constant 1.000000e+00 : f32
    %11 = vector.broadcast %cst_7 : f32 to vector<16x128xf32>
    %12 = arith.addf %11, %10 : vector<16x128xf32>
    %13 = arith.mulf %7, %12 : vector<16x128xf32>
    %c0_8 = arith.constant 0 : index
    %c0_9 = arith.constant 0 : index
    %14 = vector.load %arg4[%c0_8, %c0_9] : memref<128x128xf32, #tpu.memory_space<vmem>>, vector<128x128xf32>
    %cst_10 = arith.constant dense<0.000000e+00> : vector<16x128xf32>
    %15 = tpu.matmul %13, %14, %cst_10 {dimension_numbers = #tpu.dot_dimension_numbers<[1], [0], [0], [1], [0, 0, 1, 1], [], []>} : vector<16x128xf32>, vector<128x128xf32>, vector<16x128xf32> -> vector<16x128xf32>
    %c0_11 = arith.constant 0 : index
    %c0_12 = arith.constant 0 : index
    %16 = vector.load %arg5[%c0_11, %c0_12] : memref<1x128xf32, #tpu.memory_space<vmem>>, vector<1x128xf32>
    %17 = vector.broadcast %16 : vector<1x128xf32> to vector<16x128xf32>
    %18 = arith.addf %15, %17 : vector<16x128xf32>
    %c0_13 = arith.constant 0 : index
    %c0_14 = arith.constant 0 : index
    %19 = vector.load %arg6[%c0_13, %c0_14] : memref<16x128xf32, #tpu.memory_space<vmem>>, vector<16x128xf32>
    tpu.vector_store %arg6[%c0_13, %c0_14], %18 {strides = array<i32>} : memref<16x128xf32, #tpu.memory_space<vmem>>, vector<16x128xf32>,
    return
  }
  func.func @transform_0(%arg0: i32) -> (i32, i32) {
    %c0_i32 = arith.constant 0 : i32
    %c0_i32_0 = arith.constant 0 : i32
    return %arg0, %c0_i32 : i32, i32
  }
  func.func @transform_1(%arg0: i32) -> (i32, i32) {
    %c0_i32 = arith.constant 0 : i32
    %c0_i32_0 = arith.constant 0 : i32
    %c0_i32_1 = arith.constant 0 : i32
    return %c0_i32, %c0_i32_0 : i32, i32
  }
  func.func @transform_2(%arg0: i32) -> (i32, i32) {
    %c0_i32 = arith.constant 0 : i32
    %c0_i32_0 = arith.constant 0 : i32
    %c0_i32_1 = arith.constant 0 : i32
    return %c0_i32, %c0_i32_0 : i32, i32
  }
  func.func @transform_3(%arg0: i32) -> (i32, i32) {
    %c0_i32 = arith.constant 0 : i32
    %c0_i32_0 = arith.constant 0 : i32
    %c0_i32_1 = arith.constant 0 : i32
    return %c0_i32, %c0_i32_0 : i32, i32
  }
  func.func @transform_4(%arg0: i32) -> (i32, i32) {
    %c0_i32 = arith.constant 0 : i32
    %c0_i32_0 = arith.constant 0 : i32
    %c0_i32_1 = arith.constant 0 : i32
    return %c0_i32, %c0_i32_0 : i32, i32
  }
  func.func @transform_5(%arg0: i32) -> (i32, i32) {
    %c0_i32 = arith.constant 0 : i32
    %c0_i32_0 = arith.constant 0 : i32
    return %arg0, %c0_i32 : i32, i32
  }
}

</mosaic_0001>

<bundles_post_ra>
// kernel: tpu_custom_call.1
= control target key start
LH: loop header
LB: loop body
LE: loop exit
PB: predicated region body
PF: predicated region fallthrough
CT: control target
= control target key end

     0   :  { %10 = vsyncpa [#allocation3], 0  ;;  %s767_s0 = inlined_call_operand.hbm [shape: f32[16,128], index: 0, kind: input, shape index: {}]   ;;  %s768_s1 = inlined_call_operand.hbm [shape: f32[128,128], index: 1, kind: input, shape index: {}]   ;;  %s769_s2 = inlined_call_operand.hbm [shape: f32[1,128], index: 2, kind: input, shape index: {}]   ;;  %s770_s3 = inlined_call_operand.hbm [shape: f32[128,128], index: 3, kind: input, shape index: {}]   ;;  %s771_s4 = inlined_call_operand.hbm [shape: f32[1,128], index: 4, kind: input, shape index: {}]   ;;  %s772_s5 = inlined_call_operand.hbm [shape: f32[16,128], index: 5, kind: output, shape index: {}]  }
   0x1   :  { %11 = vsyncpa [#allocation6], 0 }
   0x2   :  { %12 = vsyncpa [#allocation9], 0 }
   0x3   :  { %13 = vsyncpa [#allocation4], 0  ;;  %s638_s18 = smov [#allocation5]   ;;  %s639_s20 = smov [#allocation8]  }
   0x4   :  { %s31_s19 = sshll.u32 %s638_s18, 4  ;;  %s53_s21 = sshll.u32 %s639_s20, 4  ;;  %s32_s19 = int_to_ptr.vmem [resolvable:$true] %s31_s19  ;;  %s676_s21 = int_to_ptr.vmem [resolvable:$true] %s53_s21 }
   0x5   :  { %s498_s24 = scalar_lea.hbm %s768_s1, 2048 }
   0x6   :  { %p499_p0 = scmp.ne.s32.totalorder %s768_s1, %s498_s24  ;;  %p502_p1 = scmp.lt.u32.totalorder %s498_s24, %s768_s1 }
   0x8   :  { %p504_p2 = pnand %p502_p1, %p499_p0 }
   0xa   :  { %507 = shalt.err (!%p504_p2)
}
   0xb   :  { %s508_s29 = scalar_lea.vmem %s32_s19, 2048  ;;  %p513_p4 = scmp.lt.s32.totalorder %s32_s19, %s32_s19 }
   0xc   :  { %p509_p3 = scmp.ne.s32.totalorder %s32_s19, %s508_s29  ;;  %p514_p5 = scmp.lt.s32.totalorder %s508_s29, %s508_s29 }
   0xe   :  { %p515_p6 = por %p514_p5, %p513_p4 }
  0x10   :  { %p516_p7 = pnand %p515_p6, %p509_p3 }
  0x12   :  { %519 = shalt.err (!%p516_p7)
}
  0x13   :  { %s640_s30 = smov 128   ;;  %s641_s6 = smov 8  }
  0x14   :  { %37 = dma.hbm_to_vmem [thread:$0]  %s768_s1, 2048, %s32_s19, [#allocation6], %s640_s30, %s640_s30, %s641_s6  }
  0x15   :  { %s520_s11 = scalar_lea.hbm %s770_s3, 2048 }
  0x16   :  { %p521_p8 = scmp.ne.s32.totalorder %s770_s3, %s520_s11  ;;  %p524_p9 = scmp.lt.u32.totalorder %s520_s11, %s770_s3 }
  0x18   :  { %p526_p10 = pnand %p524_p9, %p521_p8 }
  0x1a   :  { %529 = shalt.err (!%p526_p10)
}
  0x1b   :  { %s530_s16 = scalar_lea.vmem %s676_s21, 2048  ;;  %p535_p12 = scmp.lt.s32.totalorder %s676_s21, %s676_s21 }
  0x1c   :  { %p531_p11 = scmp.ne.s32.totalorder %s676_s21, %s530_s16  ;;  %p536_p13 = scmp.lt.s32.totalorder %s530_s16, %s530_s16 }
  0x1e   :  { %p537_p0 = por %p536_p13, %p535_p12 }
  0x20   :  { %p538_p1 = pnand %p537_p0, %p531_p11 }
  0x22   :  { %541 = shalt.err (!%p538_p1)
}
  0x23   :  { %59 = dma.hbm_to_vmem [thread:$0]  %s770_s3, 2048, %s676_s21, [#allocation9], %s640_s30, %s640_s30, %s641_s6  }
  0x24   :  { %s642_s18 = smov [#allocation2]   ;;  %s643_s20 = smov [#allocation7]  }
  0x25   :  { %s19_s19 = sshll.u32 %s642_s18, 4  ;;  %s44_s22 = sshll.u32 %s643_s20, 4  ;;  %s20_s19 = int_to_ptr.vmem [resolvable:$true] %s19_s19  ;;  %s45_s22 = int_to_ptr.vmem [resolvable:$true] %s44_s22 }
  0x26   :  { %s542_s25 = scalar_lea.hbm %s767_s0, 256 }
  0x27   :  { %p543_p2 = scmp.ne.s32.totalorder %s767_s0, %s542_s25  ;;  %p546_p3 = scmp.lt.u32.totalorder %s542_s25, %s767_s0 }
  0x29   :  { %p548_p4 = pnand %p546_p3, %p543_p2 }
  0x2b   :  { %551 = shalt.err (!%p548_p4)
}
  0x2c   :  { %s552_s3 = scalar_lea.vmem %s20_s19, 256  ;;  %p557_p6 = scmp.lt.s32.totalorder %s20_s19, %s20_s19 }
  0x2d   :  { %p553_p5 = scmp.ne.s32.totalorder %s20_s19, %s552_s3  ;;  %p558_p7 = scmp.lt.s32.totalorder %s552_s3, %s552_s3 }
  0x2f   :  { %p559_p8 = por %p558_p7, %p557_p6 }
  0x31   :  { %p560_p9 = pnand %p559_p8, %p553_p5 }
  0x33   :  { %563 = shalt.err (!%p560_p9)
}
  0x34   :  { %25 = dma.hbm_to_vmem [thread:$0]  %s767_s0, 256, %s20_s19, [#allocation3], %s640_s30, %s640_s30, %s641_s6  }
  0x35   :  { %s564_s10 = scalar_lea.hbm %s769_s2, 16 }
  0x36   :  { %p565_p10 = scmp.ne.s32.totalorder %s769_s2, %s564_s10  ;;  %p568_p11 = scmp.lt.u32.totalorder %s564_s10, %s769_s2 }
  0x38   :  { %p570_p12 = pnand %p568_p11, %p565_p10 }
  0x3a   :  { %573 = shalt.err (!%p570_p12)
}
  0x3b   :  { %s574_s15 = scalar_lea.vmem %s45_s22, 16  ;;  %s578_s16 = scalar_lea.vmem %s45_s22, 32 }
  0x3c   :  { %p575_p13 = scmp.ne.s32.totalorder %s45_s22, %s574_s15  ;;  %p579_p0 = scmp.lt.s32.totalorder %s45_s22, %s45_s22 }
  0x3d   :  { %p580_p1 = scmp.lt.s32.totalorder %s578_s16, %s574_s15 }
  0x3f   :  { %p581_p2 = por %p580_p1, %p579_p0 }
  0x41   :  { %p582_p3 = pnand %p581_p2, %p575_p13 }
  0x43   :  { %585 = shalt.err (!%p582_p3)
}
  0x44   :  { %47 = dma.hbm_to_vmem [thread:$0]  %s769_s2, 16, %s45_s22, [#allocation6]  }
  0x45   :  { %s644_s17 = smov [#allocation10]   ;;  %s586_s23 = scalar_lea.hbm %s771_s4, 16 }
  0x46   :  { %s66_s18 = sshll.u32 %s644_s17, 4  ;;  %p587_p4 = scmp.ne.s32.totalorder %s771_s4, %s586_s23  ;;  %s67_s18 = int_to_ptr.vmem [resolvable:$true] %s66_s18 }
  0x47   :  { %p590_p5 = scmp.lt.u32.totalorder %s586_s23, %s771_s4 }
  0x49   :  { %p592_p6 = pnand %p590_p5, %p587_p4 }
  0x4b   :  { %595 = shalt.err (!%p592_p6)
}
  0x4c   :  { %s596_s28 = scalar_lea.vmem %s67_s18, 16  ;;  %s600_s2 = scalar_lea.vmem %s67_s18, 32 }
  0x4d   :  { %p597_p7 = scmp.ne.s32.totalorder %s67_s18, %s596_s28  ;;  %p601_p8 = scmp.lt.s32.totalorder %s67_s18, %s67_s18 }
  0x4e   :  { %p602_p9 = scmp.lt.s32.totalorder %s600_s2, %s596_s28 }
  0x50   :  { %p603_p10 = por %p602_p9, %p601_p8 }
  0x52   :  { %p604_p11 = pnand %p603_p10, %p597_p7 }
  0x54   :  { %607 = shalt.err (!%p604_p11)
}
  0x55   :  { %69 = dma.hbm_to_vmem [thread:$0]  %s771_s4, 16, %s67_s18, [#allocation9]  }
  0x56   :  { %630 = dma.done.wait [#allocation3], 256  }
  0x57   :  { %631 = vsyncadd [#allocation3], 4294967040 }
  0x58   :  { %632 = dma.done.wait [#allocation6], 2064  }
  0x59   :  { %633 = vsyncadd [#allocation6], 4294965232 }
  0x5a   :  { %634 = dma.done.wait [#allocation9], 2064  }
  0x5b   :  { %635 = vsyncadd [#allocation9], 4294965232  ;;  %v87_v0 = vld [vmem:[#allocation5] sm:$0xff]  ;;  %v88_v1 = vld [vmem:[#allocation5 + $0x8] sm:$0xff]  ;;  %s645_s4 = smov [#allocation11]  }
  0x5c   :  { %v89_v2 = vld [vmem:[#allocation5 + $0x10] sm:$0xff]  ;;  %v422_v3 = vpack.c.bf16 %v88_v1, %v87_v0  ;;  %v90_v4 = vld [vmem:[#allocation5 + $0x18] sm:$0xff]  ;;  %v91_v6 = vld [vmem:[#allocation5 + $0x20] sm:$0xff]  ;;  %s300_s3 = sshll.u32 %s645_s4, 4  ;;  %s301_s3 = int_to_ptr.vmem [resolvable:$true] %s300_s3 }
  0x5d   :  { %v426_v5 = vpack.c.bf16 %v90_v4, %v89_v2  ;;  %v92_v7 = vld [vmem:[#allocation5 + $0x28] sm:$0xff]  ;;  %v93_v9 = vld [vmem:[#allocation5 + $0x30] sm:$0xff]  ;;  %v94_v10 = vld [vmem:[#allocation5 + $0x38] sm:$0xff]  ;;  %s608_s21 = scalar_lea.vmem %s301_s3, 256  ;;  %p613_p13 = scmp.lt.s32.totalorder %s301_s3, %s301_s3 }
  0x5e   :  { %423 = vmatprep.subr.bf16.mxu0 %v422_v3  ;;  %v430_v8 = vpack.c.bf16 %v92_v7, %v91_v6  ;;  %v85_v11 = vld [vmem:[#allocation2] sm:$0xff]  ;;  %v195_v12 = vld [vmem:[#allocation8] sm:$0xff]  ;;  %v198_v16 = vld [vmem:[#allocation8 + $0x18] sm:$0xff]  ;;  %v434_v20 = vpack.c.bf16 %v94_v10, %v93_v9  ;;  %p609_p12 = scmp.ne.s32.totalorder %s301_s3, %s608_s21  ;;  %p614_p0 = scmp.lt.s32.totalorder %s608_s21, %s608_s21 }
  0x5f   :  { %425 = vmatpush3.bf16.msra.mxu0 %v422_v3  ;;  %384 = vmatprep.mubr.f32.mxu0 %v85_v11  ;;  %v196_v13 = vld [vmem:[#allocation8 + $0x8] sm:$0xff]  ;;  %v197_v14 = vld [vmem:[#allocation8 + $0x10] sm:$0xff]  ;;  %v199_v18 = vld [vmem:[#allocation8 + $0x20] sm:$0xff] }
  0x60   :  { %427 = vmatprep.subr.bf16.mxu0 %v426_v5  ;;  %v454_v15 = vpack.c.bf16 %v196_v13, %v195_v12  ;;  %v458_v17 = vpack.c.bf16 %v198_v16, %v197_v14  ;;  %v200_v19 = vld [vmem:[#allocation8 + $0x28] sm:$0xff]  ;;  %v95_v21 = vld [vmem:[#allocation5 + $0x40] sm:$0xff]  ;;  %v98_v26 = vld [vmem:[#allocation5 + $0x58] sm:$0xff]  ;;  %p615_p1 = por %p614_p0, %p613_p13 }
  0x61   :  { %v96_v22 = vld [vmem:[#allocation5 + $0x48] sm:$0xff]  ;;  %v462_v23 = vpack.c.bf16 %v200_v19, %v199_v18  ;;  %v97_v25 = vld [vmem:[#allocation5 + $0x50] sm:$0xff]  ;;  %v99_v28 = vld [vmem:[#allocation5 + $0x60] sm:$0xff] }
  0x62   :  { %455 = vmatprep.subr.bf16.mxu1 %v454_v15  ;;  %v438_v24 = vpack.c.bf16 %v96_v22, %v95_v21  ;;  %v442_v27 = vpack.c.bf16 %v98_v26, %v97_v25  ;;  %v100_v29 = vld [vmem:[#allocation5 + $0x68] sm:$0xff]  ;;  %v101_v31 = vld [vmem:[#allocation5 + $0x70] sm:$0xff]  ;;  %v102_v32 = vld [vmem:[#allocation5 + $0x78] sm:$0xff]  ;;  %p616_p2 = pnand %p615_p1, %p609_p12 }
  0x63   :  { %429 = vmatpush3.bf16.msra.mxu0 %v426_v5  ;;  %457 = vmatpush3.bf16.msra.mxu1 %v454_v15  ;;  %v446_v30 = vpack.c.bf16 %v100_v29, %v99_v28  ;;  %v450_v33 = vpack.c.bf16 %v102_v32, %v101_v31  ;;  %v86_v34 = vld [vmem:[#allocation2 + $0x8] sm:$0xff]  ;;  %v203_v38 = vld [vmem:[#allocation8 + $0x40] sm:$0xff]  ;;  %v204_v39 = vld [vmem:[#allocation8 + $0x48] sm:$0xff] }
  0x64   :  { %431 = vmatprep.subr.bf16.mxu0 %v430_v8  ;;  %459 = vmatprep.subr.bf16.mxu1 %v458_v17  ;;  %v201_v35 = vld [vmem:[#allocation8 + $0x30] sm:$0xff]  ;;  %v202_v36 = vld [vmem:[#allocation8 + $0x38] sm:$0xff]  ;;  %v470_v40 = vpack.c.bf16 %v204_v39, %v203_v38  ;;  %v207_v44 = vld [vmem:[#allocation8 + $0x60] sm:$0xff] }
  0x65   :  { %v466_v37 = vpack.c.bf16 %v202_v36, %v201_v35  ;;  %v205_v41 = vld [vmem:[#allocation8 + $0x50] sm:$0xff]  ;;  %v206_v42 = vld [vmem:[#allocation8 + $0x58] sm:$0xff]  ;;  %v208_v45 = vld [vmem:[#allocation8 + $0x68] sm:$0xff] }
  0x66   :  { %v474_v43 = vpack.c.bf16 %v206_v42, %v205_v41  ;;  %v478_v46 = vpack.c.bf16 %v208_v45, %v207_v44  ;;  %v209_v47 = vld [vmem:[#allocation8 + $0x70] sm:$0xff]  ;;  %v210_v48 = vld [vmem:[#allocation8 + $0x78] sm:$0xff]  ;;  %v315_v1 = vld [vmem:[#allocation10] ss:$0 sm:$0xff] }
  0x67   :  { %433 = vmatpush3.bf16.msra.mxu0 %v430_v8  ;;  %461 = vmatpush3.bf16.msra.mxu1 %v458_v17  ;;  %v482_v49 = vpack.c.bf16 %v210_v48, %v209_v47  ;;  %v314_v50 = vld [vmem:[#allocation7] ss:$0 sm:$0xff] }
  0x68   :  { %435 = vmatprep.subr.bf16.mxu0 %v434_v20  ;;  %463 = vmatprep.subr.bf16.mxu1 %v462_v23 }
  0x6b   :  { %437 = vmatpush3.bf16.msra.mxu0 %v434_v20  ;;  %465 = vmatpush3.bf16.msra.mxu1 %v462_v23 }
  0x6c   :  { %439 = vmatprep.subr.bf16.mxu0 %v438_v24  ;;  %467 = vmatprep.subr.bf16.mxu1 %v466_v37 }
  0x6f   :  { %441 = vmatpush3.bf16.msra.mxu0 %v438_v24  ;;  %469 = vmatpush3.bf16.msra.mxu1 %v466_v37 }
  0x70   :  { %443 = vmatprep.subr.bf16.mxu0 %v442_v27  ;;  %471 = vmatprep.subr.bf16.mxu1 %v470_v40 }
  0x73   :  { %445 = vmatpush3.bf16.msra.mxu0 %v442_v27  ;;  %473 = vmatpush3.bf16.msra.mxu1 %v470_v40 }
  0x74   :  { %447 = vmatprep.subr.bf16.mxu0 %v446_v30  ;;  %475 = vmatprep.subr.bf16.mxu1 %v474_v43 }
  0x77   :  { %449 = vmatpush3.bf16.msra.mxu0 %v446_v30  ;;  %477 = vmatpush3.bf16.msra.mxu1 %v474_v43 }
  0x78   :  { %451 = vmatprep.subr.bf16.mxu0 %v450_v33  ;;  %479 = vmatprep.subr.bf16.mxu1 %v478_v46 }
  0x7b   :  { %453 = vmatpush3.bf16.msra.mxu0 %v450_v33  ;;  %481 = vmatpush3.bf16.msra.mxu1 %v478_v46 }
  0x7c   :  { %483 = vmatprep.subr.bf16.mxu1 %v482_v49 }
  0x7e   :  { %385 = vmatmul.mubr.f32.vlgmr.msra.gmra.mrb[0].mxu0 %v86_v34 }
  0x7f   :  { %485 = vmatpush3.bf16.msra.mxu1 %v482_v49 }
 0x151   :  { %v386_v51 = vpop.f32.mrb[0].mxu0 }
 0x152   :  { %v182_v52 = vadd.f32 %v386_v51, %v314_v50  ;;  %v176_v53 = vpop.f32.mrb[1].mxu0 }
 0x153   :  { %v177_v54 = vadd.f32 %v314_v50, %v176_v53 }
 0x154   :  { %v188_v55 = vmul.f32 0.70710677, %v182_v52  ;;  %v186_v62 = vmul.f32 0.5, %v182_v52 }
 0x155   :  { %v187_v56 = vmul.f32 0.70710677, %v177_v54  ;;  %v185_v60 = vmul.f32 0.5, %v177_v54 }
 0x156   :  { %494 = verf.f32 %v188_v55 }
 0x157   :  { %496 = verf.f32 %v187_v56 }
 0x160   :  { %v495_v57 = vpop.eup %494 }
 0x161   :  { %v497_v58 = vpop.eup %496  ;;  %v192_v59 = vadd.f32 1.0, %v495_v57 }
 0x162   :  { %v191_v61 = vadd.f32 1.0, %v497_v58 }
 0x163   :  { %v194_v0 = vmul.f32 %v192_v59, %v186_v62 }
 0x164   :  { %v193_v63 = vmul.f32 %v191_v61, %v185_v60 }
 0x166   :  { %419 = vmatprep.mubr.f32.mxu1 %v193_v63 }
 0x167   :  { %420 = vmatmul.mubr.f32.vlgmr.msra.gmra.mrb[0].mxu1 %v194_v0 }
 0x23a   :  { %v421_v2 = vpop.f32.mrb[0].mxu1 }
 0x23b   :  { %v290_v3 = vadd.f32 %v421_v2, %v315_v1  ;;  %v284_v4 = vpop.f32.mrb[1].mxu1 }
 0x23c   :  { %v285_v5 = vadd.f32 %v315_v1, %v284_v4 }
 0x23d   :  { %294 = vst [vmem:[#allocation11 + $0x8] sm:$0xff] %v290_v3 }
 0x23e   :  { %293 = vst [vmem:[#allocation11] sm:$0xff] %v285_v5 }
 0x23f   :  { %619 = shalt.err (!%p616_p2)
}
 0x240   :  { %s620_s9 = scalar_lea.hbm %s772_s5, 256 }
 0x241   :  { %p621_p3 = scmp.ne.s32.totalorder %s772_s5, %s620_s9  ;;  %p624_p4 = scmp.lt.u32.totalorder %s620_s9, %s772_s5 }
 0x243   :  { %p626_p5 = pnand %p624_p4, %p621_p3 }
 0x245   :  { %629 = shalt.err (!%p626_p5)
}
 0x246   :  { %306 = dma.vmem_to_hbm [thread:$0]  %s301_s3, 256, %s772_s5, [#allocation4], %s640_s30, %s640_s30, %s641_s6  }
 0x247   :  { %636 = dma.done.wait [#allocation4], 256  }
 0x248   :  { %637 = vsyncadd [#allocation4], 4294967040 }
 0x249   :  { %310 = vsyncpa [#allocation3], 1 }
 0x24a   :  { %311 = vsyncpa [#allocation6], 1 }
 0x24b   :  { %312 = vsyncpa [#allocation9], 1 }
 0x24c   :  { %313 = vsyncpa [#allocation4], 1 }

</bundles_post_ra>
